<compile_context>
chip_gen: v6e
topology: v6e:2x2x1
jax: 0.10.0
libtpu: 0.0.40
codegen_flags: <defaults>
</compile_context>

<pallas_src>
import jax
import jax.numpy as jnp
from jax.experimental import pallas as pl
from jax.experimental.pallas import tpu as pltpu


# ----------------------------------------------------------------------------
# Kernels
# ----------------------------------------------------------------------------
def _touch_kernel(x_ref, o_ref):
    # Output aliases the input; data is already in place. `touch` installs a
    # fake read+write dependency so the aliased output is considered
    # materialized by this kernel without any data movement.
    del x_ref
    pltpu.touch(o_ref)


def _dma_copy_kernel(x_ref, o_ref, sem):
    # Fallback: one direct HBM->HBM DMA (no VMEM staging, no tiling).
    cp = pltpu.make_async_copy(x_ref, o_ref, sem)
    cp.start()
    cp.wait()


# ----------------------------------------------------------------------------
# pallas_call wrappers
# ----------------------------------------------------------------------------
def _identity_alias(x: jax.Array) -> jax.Array:
    """Zero-copy identity: aliased output in ANY memory space, no-op body."""
    return pl.pallas_call(
        _touch_kernel,
        out_shape=jax.ShapeDtypeStruct(x.shape, x.dtype),
        in_specs=[pl.BlockSpec(memory_space=pl.ANY)],
        out_specs=pl.BlockSpec(memory_space=pl.ANY),
        input_output_aliases={0: 0},
        compiler_params=pltpu.CompilerParams(has_side_effects=True),
    )(x)


def _identity_dma(x: jax.Array) -> jax.Array:
    """Fallback identity: single HBM->HBM DMA copy, no aliasing, no VMEM."""
    nbytes = x.size * x.dtype.itemsize
    return pl.pallas_call(
        _dma_copy_kernel,
        out_shape=jax.ShapeDtypeStruct(x.shape, x.dtype),
        in_specs=[pl.BlockSpec(memory_space=pl.ANY)],
        out_specs=pl.BlockSpec(memory_space=pl.ANY),
        scratch_shapes=[pltpu.SemaphoreType.DMA],
        # Advisory hint so XLA models this as a pure memory op and overlaps
        # neighbouring HLO around it.
        cost_estimate=pl.CostEstimate(
            flops=0, transcendentals=0, bytes_accessed=2 * nbytes
        ),
    )(x)


def pallas_print(x: jax.Array) -> jax.Array:
    """Identity op that prints the tensor shape (debug module).

    Analogue of the torch `print(x.shape)`. Under jit this fires once per
    traced shape rather than per call (documented behavioral difference).
    """
    print(x.shape)
    try:
        return _identity_alias(x)
    except Exception:
        # TODO(synk): remove fallback once the ANY+touch zero-copy path is
        # verified on all deployed runtimes; it is the preferred path.
        return _identity_dma(x)


# ----------------------------------------------------------------------------
# Self-test
# ----------------------------------------------------------------------------
if __name__ == "__main__":
    key = jax.random.PRNGKey(0)
    # Small NCHW-style input consistent with typical nn.Sequential usage.
    x = jax.random.normal(key, (2, 4, 16, 16), dtype=jnp.float32)

    y = pallas_print(x)
    y = jax.block_until_ready(y)

    assert y.shape == x.shape
    assert y.dtype == x.dtype
    assert bool(jnp.array_equal(y, x))

    print("KERNEL_OK")
</pallas_src>

<mosaic_0001>
module attributes {stable_mosaic.version = 11 : i64} {
  func.func @_touch_kernel(%arg0: memref<2x4x16x16xf32, #tpu.memory_space<any>>, %arg1: memref<2x4x16x16xf32, #tpu.memory_space<any>>) attributes {dimension_semantics = [], scalar_prefetch = 0 : i64, scratch_operands = 0 : i64, tpu.core_type = #tpu.core_type<tc>} {
    return
  }
}

module attributes {stable_mosaic.version = 11 : i64} {
  func.func @_dma_copy_kernel(%arg0: memref<2x4x16x16xf32, #tpu.memory_space<any>>, %arg1: memref<2x4x16x16xf32, #tpu.memory_space<any>>, %arg2: memref<!tpu.dma_semaphore, #tpu.memory_space<semaphore_mem>>) attributes {dimension_semantics = [], scalar_prefetch = 0 : i64, scratch_operands = 1 : i64, tpu.core_type = #tpu.core_type<tc>} {
    tpu.enqueue_dma source(%arg0 : memref<2x4x16x16xf32, #tpu.memory_space<any>>) target(%arg1 : memref<2x4x16x16xf32, #tpu.memory_space<any>>) target_semaphore(%arg2 : memref<!tpu.dma_semaphore, #tpu.memory_space<semaphore_mem>>)
    tpu.wait_dma2 semaphore(%arg2 : memref<!tpu.dma_semaphore, #tpu.memory_space<semaphore_mem>>) src(%arg0 : memref<2x4x16x16xf32, #tpu.memory_space<any>>) dst(%arg1 : memref<2x4x16x16xf32, #tpu.memory_space<any>>)
    return
  }
}

</mosaic_0001>

<bundles_post_ra>
// kernel: tpu_custom_call.1
= control target key start
LH: loop header
LB: loop body
LE: loop exit
PB: predicated region body
PF: predicated region fallthrough
CT: control target
= control target key end

     0   :  { %s16_s0 = inlined_call_operand.hbm [shape: f32[2,4,16,16], index: 0, kind: input, shape index: {}, may-alias: {0,1}]   ;;  %s17_s1 = inlined_call_operand.hbm [shape: f32[2,4,16,16], index: 1, kind: output, shape index: {}, may-alias: {0,1}]  }

// kernel: tpu_custom_call.1
= control target key start
LH: loop header
LB: loop body
LE: loop exit
PB: predicated region body
PF: predicated region fallthrough
CT: control target
= control target key end

     0   :  { %s30_s6 = smov [#allocation2]   ;;  %s31_s7 = smov 131072   ;;  %s49_s0 = inlined_call_operand.hbm [shape: f32[2,4,16,16], index: 0, kind: input, shape index: {}]   ;;  %s50_s1 = inlined_call_operand.hbm [shape: f32[2,4,16,16], index: 1, kind: output, shape index: {}]  }
   0x1   :  { %s32_s8 = smov 0  }
   0x2   :  { %12 = dma.general %s49_s0, 2048, %s50_s1, %s30_s6, %s31_s7, [#allocation4], %s32_s8, 0  }
   0x3   :  { %28 = dma.done.wait [#allocation2], 2048 }
   0x4   :  { %29 = vsyncadd [#allocation2], 4294965248 }
   0x5   :  { %18 = vsyncmov [#allocation2] }
   0x8   :  { %s19_s13 = vpop.sfrf %18 }
   0x9   :  { %p24_p0 = scmp.ne.s32.totalorder %s19_s13, 0 }
   0xb   :  { %23 = shalt.err (%p24_p0)  }

</bundles_post_ra>
